<compile_context>
chip_gen: v5e
topology: v5e:2x2
jax: 0.10.0
libtpu: 0.0.40
codegen_flags: <defaults>
</compile_context>

<pallas_src>
import jax
import jax.numpy as jnp
from jax.experimental import pallas as pl
from jax.experimental.pallas import tpu as pltpu


_DEFAULT_TILE_B = 2048   # rows per grid step (f32); big enough to amortize
                         # the ~0.35 us/step pipeline overhead.


# --------------------------------------------------------------------------
# Kernels
# --------------------------------------------------------------------------
def _sideinfo_douban_kernel(genre_ref, director_ref, actor_ref,
                            wg_ref, wd_ref, wa_ref, b_ref, out_ref):
    # genre_ref:    (TB, Ng*E)  flattened, lane-dense (f32 or bf16)
    # director_ref: (TB, E)
    # actor_ref:    (TB, Na*E)
    # wg_ref:       (1, Ng*E)   = tile(w_genre, Ng) / Ng   (mean folded in, f32)
    # wd_ref:       (1, E)      = w_director
    # wa_ref:       (1, Na*E)   = tile(w_actor, Na) / Na   (mean folded in)
    # b_ref:        (1, 1)
    # out_ref:      (TB, 1)
    g = genre_ref[...].astype(jnp.float32)
    d = director_ref[...].astype(jnp.float32)
    a = actor_ref[...].astype(jnp.float32)
    y = (jnp.sum(g * wg_ref[...], axis=-1, keepdims=True)
         + jnp.sum(d * wd_ref[...], axis=-1, keepdims=True)
         + jnp.sum(a * wa_ref[...], axis=-1, keepdims=True)
         + b_ref[...])                                    # (TB, 1) f32
    out_ref[...] = jnp.maximum(y, 0.0).astype(out_ref.dtype)


def _sideinfo_simple_kernel(genre_ref, wg_ref, b_ref, out_ref):
    # genre_ref: (TB, Ng*E), wg_ref: (1, Ng*E) (mean folded in), b_ref: (1,1)
    g = genre_ref[...].astype(jnp.float32)
    y = jnp.sum(g * wg_ref[...], axis=-1, keepdims=True) + b_ref[...]
    out_ref[...] = jnp.maximum(y, 0.0).astype(out_ref.dtype)


# --------------------------------------------------------------------------
# Tiling helpers
# --------------------------------------------------------------------------
def _round_up(x, m):
    return ((x + m - 1) // m) * m


def _choose_tile(B, tile_b):
    """Pick a batch tile.

    * B < 16          : single full-array block (tiny batch).
    * 16 <= B <= tile : split into (at least) 2 blocks so both v7x TensorCores
                        get work under dimension_semantics=("parallel",).
    * B > tile        : use tile_b (must be a multiple of 8).
    """
    if B > tile_b:
        assert tile_b % 8 == 0, f"tile_b ({tile_b}) must be a multiple of 8"
        return tile_b
    if B >= 16:
        return _round_up(-(-B // 2), 8)   # ceil(B/2) rounded up to 8
    return B


def _vmem_limit_bytes(tb, lane_widths, in_bytes):
    """Estimate scoped-VMEM need: double-buffered, lane-padded input tiles."""
    padded = sum(_round_up(w, 128) for w in lane_widths)
    est = 2 * tb * padded * in_bytes          # double-buffered input slabs
    est += 2 * 1024 * 1024                    # weights, output, slack
    return int(min(max(2 * est, 32 * 1024 * 1024), 64 * 1024 * 1024))


# --------------------------------------------------------------------------
# Wrappers
# --------------------------------------------------------------------------
def sideinfo_forward_douban(genre_embed, director_embed, actor_embed, W, b,
                            *, tile_b=_DEFAULT_TILE_B):
    """is_douban=True path.

    genre_embed:    (B, Ng, E)   f32 or bf16
    director_embed: (B, E)
    actor_embed:    (B, Na, E)
    W:              (3*E, 1)  -- nn.Linear(3E, 1).weight transposed (W.T),
                                 rows ordered [genre_mean | director | actor_mean]
    b:              (1,)
    returns:        (B, 1) float32
    """
    B, Ng, E = genre_embed.shape
    Ba, Na, Ea = actor_embed.shape
    assert W.shape == (3 * E, 1), f"expected W of shape {(3 * E, 1)}, got {W.shape}"
    assert b.shape == (1,)
    assert director_embed.shape == (B, E) and Ba == B and Ea == E

    # Lane-dense 2-D slabs (free reshape of contiguous arrays, no HBM copy).
    genre_flat = genre_embed.reshape(B, Ng * E)
    actor_flat = actor_embed.reshape(B, Na * E)

    # Fold the mean divisors into tiled per-slice weight rows (f32 consts).
    w = W[:, 0].astype(jnp.float32)
    wg = (jnp.tile(w[:E], Ng) / Ng).reshape(1, Ng * E)
    wd = w[E:2 * E].reshape(1, E)
    wa = (jnp.tile(w[2 * E:], Na) / Na).reshape(1, Na * E)
    b11 = b.reshape(1, 1).astype(jnp.float32)

    tb = _choose_tile(B, tile_b)
    n_blocks = pl.cdiv(B, tb)
    in_bytes = jnp.dtype(genre_embed.dtype).itemsize
    vmem_limit = _vmem_limit_bytes(tb, (Ng * E, E, Na * E), in_bytes)

    # No input padding: boundary blocks over-read garbage rows which are
    # row-independent; OOB output rows are dropped by Pallas.
    out = pl.pallas_call(
        _sideinfo_douban_kernel,
        out_shape=jax.ShapeDtypeStruct((B, 1), jnp.float32),
        grid=(n_blocks,),
        in_specs=[
            pl.BlockSpec((tb, Ng * E), lambda i: (i, 0)),
            pl.BlockSpec((tb, E), lambda i: (i, 0)),
            pl.BlockSpec((tb, Na * E), lambda i: (i, 0)),
            # Weights / bias: constant index_map -> loaded once, stay resident.
            pl.BlockSpec((1, Ng * E), lambda i: (0, 0)),
            pl.BlockSpec((1, E), lambda i: (0, 0)),
            pl.BlockSpec((1, Na * E), lambda i: (0, 0)),
            pl.BlockSpec((1, 1), lambda i: (0, 0)),
        ],
        out_specs=pl.BlockSpec((tb, 1), lambda i: (i, 0)),
        compiler_params=pltpu.CompilerParams(
            dimension_semantics=("parallel",),
            vmem_limit_bytes=vmem_limit),
    )(genre_flat, director_embed, actor_flat, wg, wd, wa, b11)
    return out


def sideinfo_forward_simple(genre_embed, W, b, *, tile_b=_DEFAULT_TILE_B):
    """is_douban=False path.

    genre_embed: (B, Ng, E)   f32 or bf16
    W:           (E, 1)   -- nn.Linear(E, 1).weight transposed (W.T)
    b:           (1,)
    returns:     (B, 1) float32
    """
    B, Ng, E = genre_embed.shape
    assert W.shape == (E, 1), f"expected W of shape {(E, 1)}, got {W.shape}"
    assert b.shape == (1,)

    genre_flat = genre_embed.reshape(B, Ng * E)
    wg = (jnp.tile(W[:, 0].astype(jnp.float32), Ng) / Ng).reshape(1, Ng * E)
    b11 = b.reshape(1, 1).astype(jnp.float32)

    tb = _choose_tile(B, tile_b)
    n_blocks = pl.cdiv(B, tb)
    in_bytes = jnp.dtype(genre_embed.dtype).itemsize
    vmem_limit = _vmem_limit_bytes(tb, (Ng * E,), in_bytes)

    out = pl.pallas_call(
        _sideinfo_simple_kernel,
        out_shape=jax.ShapeDtypeStruct((B, 1), jnp.float32),
        grid=(n_blocks,),
        in_specs=[
            pl.BlockSpec((tb, Ng * E), lambda i: (i, 0)),
            pl.BlockSpec((1, Ng * E), lambda i: (0, 0)),
            pl.BlockSpec((1, 1), lambda i: (0, 0)),
        ],
        out_specs=pl.BlockSpec((tb, 1), lambda i: (i, 0)),
        compiler_params=pltpu.CompilerParams(
            dimension_semantics=("parallel",),
            vmem_limit_bytes=vmem_limit),
    )(genre_flat, wg, b11)
    return out


# --------------------------------------------------------------------------
# Reference (pure JAX) for verification
# --------------------------------------------------------------------------
def ref_douban(genre_embed, director_embed, actor_embed, W, b):
    g = genre_embed.astype(jnp.float32).mean(axis=1)
    a = actor_embed.astype(jnp.float32).mean(axis=1)
    x = jnp.concatenate([g, director_embed.astype(jnp.float32), a], axis=1)
    return jnp.maximum(x @ W + b, 0.0)


def ref_simple(genre_embed, W, b):
    g = genre_embed.astype(jnp.float32).mean(axis=1)
    return jnp.maximum(g @ W + b, 0.0)


# --------------------------------------------------------------------------
if __name__ == "__main__":
    E = 32         # config.embed_size
    NG = 5         # number of genres per item
    NA = 6         # number of actors per item

    key = jax.random.PRNGKey(0)
    k1, k2, k3, k4, k5, k6, k7 = jax.random.split(key, 7)

    bound_d = 1.0 / jnp.sqrt(3.0 * E)
    W_douban = jax.random.uniform(k4, (3 * E, 1), jnp.float32, -bound_d, bound_d)
    b_douban = jax.random.uniform(k5, (1,), jnp.float32, -bound_d, bound_d)
    bound_s = 1.0 / jnp.sqrt(1.0 * E)
    W_simple = jax.random.uniform(k6, (E, 1), jnp.float32, -bound_s, bound_s)
    b_simple = jax.random.uniform(k7, (1,), jnp.float32, -bound_s, bound_s)

    # --- Case 1: tiny batch (single block, tb = B) --------------------------
    B = 2
    genre_embed = jax.random.normal(k1, (B, NG, E), dtype=jnp.float32)
    director_embed = jax.random.normal(k2, (B, E), dtype=jnp.float32)
    actor_embed = jax.random.normal(k3, (B, NA, E), dtype=jnp.float32)

    out_d = jax.block_until_ready(
        sideinfo_forward_douban(genre_embed, director_embed, actor_embed,
                                W_douban, b_douban))
    ref_d = ref_douban(genre_embed, director_embed, actor_embed,
                       W_douban, b_douban)
    out_s = jax.block_until_ready(
        sideinfo_forward_simple(genre_embed, W_simple, b_simple))
    ref_s = ref_simple(genre_embed, W_simple, b_simple)

    assert out_d.shape == (B, 1) and out_s.shape == (B, 1)
    assert jnp.allclose(out_d, ref_d, atol=1e-5, rtol=1e-4)
    assert jnp.allclose(out_s, ref_s, atol=1e-5, rtol=1e-4)

    # --- Case 2: multi-block ragged batch (B=20, tile_b=8 -> 3 steps) -------
    B2 = 20
    kk = jax.random.split(jax.random.PRNGKey(1), 3)
    genre2 = jax.random.normal(kk[0], (B2, NG, E), dtype=jnp.float32)
    director2 = jax.random.normal(kk[1], (B2, E), dtype=jnp.float32)
    actor2 = jax.random.normal(kk[2], (B2, NA, E), dtype=jnp.float32)

    out_d2 = jax.block_until_ready(
        sideinfo_forward_douban(genre2, director2, actor2,
                                W_douban, b_douban, tile_b=8))
    ref_d2 = ref_douban(genre2, director2, actor2, W_douban, b_douban)
    out_s2 = jax.block_until_ready(
        sideinfo_forward_simple(genre2, W_simple, b_simple, tile_b=8))
    ref_s2 = ref_simple(genre2, W_simple, b_simple)

    assert out_d2.shape == (B2, 1) and out_s2.shape == (B2, 1)
    assert jnp.allclose(out_d2, ref_d2, atol=1e-5, rtol=1e-4)
    assert jnp.allclose(out_s2, ref_s2, atol=1e-5, rtol=1e-4)

    # --- Case 3: bf16 embeddings (half HBM traffic), f32 accumulation -------
    genre_bf = genre2.astype(jnp.bfloat16)
    director_bf = director2.astype(jnp.bfloat16)
    actor_bf = actor2.astype(jnp.bfloat16)
    out_d3 = jax.block_until_ready(
        sideinfo_forward_douban(genre_bf, director_bf, actor_bf,
                                W_douban, b_douban))
    ref_d3 = ref_douban(genre_bf, director_bf, actor_bf, W_douban, b_douban)
    assert out_d3.shape == (B2, 1)
    assert jnp.allclose(out_d3, ref_d3, atol=2e-2, rtol=2e-2)

    print("KERNEL_OK")
</pallas_src>

<mosaic_0001>
module attributes {stable_mosaic.version = 11 : i64} {
  func.func @_sideinfo_douban_kernel(%arg0: i32, %arg1: memref<2x160xf32, #tpu.memory_space<vmem>>, %arg2: memref<2x32xf32, #tpu.memory_space<vmem>>, %arg3: memref<2x192xf32, #tpu.memory_space<vmem>>, %arg4: memref<1x160xf32, #tpu.memory_space<vmem>>, %arg5: memref<1x32xf32, #tpu.memory_space<vmem>>, %arg6: memref<1x192xf32, #tpu.memory_space<vmem>>, %arg7: memref<1x1xf32, #tpu.memory_space<vmem>>, %arg8: memref<2x1xf32, #tpu.memory_space<vmem>>) attributes {dimension_semantics = [#tpu.dimension_semantics<parallel>], iteration_bounds = array<i64: 1>, scalar_prefetch = 0 : i64, scratch_operands = 0 : i64, tpu.core_type = #tpu.core_type<tc>, window_params = [{transform_indices = @transform_0, window_bounds = array<i64: 2, 160>}, {transform_indices = @transform_1, window_bounds = array<i64: 2, 32>}, {transform_indices = @transform_2, window_bounds = array<i64: 2, 192>}, {pipeline_mode = #tpu.pipeline_mode<synchronous>, transform_indices = @transform_3, window_bounds = array<i64: 1, 160>}, {pipeline_mode = #tpu.pipeline_mode<synchronous>, transform_indices = @transform_4, window_bounds = array<i64: 1, 32>}, {pipeline_mode = #tpu.pipeline_mode<synchronous>, transform_indices = @transform_5, window_bounds = array<i64: 1, 192>}, {pipeline_mode = #tpu.pipeline_mode<synchronous>, transform_indices = @transform_6, window_bounds = array<i64: 1, 1>}, {transform_indices = @transform_7, window_bounds = array<i64: 2, 1>}]} {
    %c0 = arith.constant 0 : index
    %c0_0 = arith.constant 0 : index
    %0 = vector.load %arg1[%c0, %c0_0] : memref<2x160xf32, #tpu.memory_space<vmem>>, vector<2x160xf32>
    %c0_1 = arith.constant 0 : index
    %c0_2 = arith.constant 0 : index
    %1 = vector.load %arg2[%c0_1, %c0_2] : memref<2x32xf32, #tpu.memory_space<vmem>>, vector<2x32xf32>
    %c0_3 = arith.constant 0 : index
    %c0_4 = arith.constant 0 : index
    %2 = vector.load %arg3[%c0_3, %c0_4] : memref<2x192xf32, #tpu.memory_space<vmem>>, vector<2x192xf32>
    %c0_5 = arith.constant 0 : index
    %c0_6 = arith.constant 0 : index
    %3 = vector.load %arg4[%c0_5, %c0_6] : memref<1x160xf32, #tpu.memory_space<vmem>>, vector<1x160xf32>
    %4 = vector.broadcast %3 : vector<1x160xf32> to vector<2x160xf32>
    %5 = arith.mulf %0, %4 : vector<2x160xf32>
    %cst = arith.constant dense<0.000000e+00> : vector<2xf32>
    %6 = vector.multi_reduction <add>, %5, %cst [1] : vector<2x160xf32> to vector<2xf32>
    %7 = vector.shape_cast %6 : vector<2xf32> to vector<2x1xf32>
    %c0_7 = arith.constant 0 : index
    %c0_8 = arith.constant 0 : index
    %8 = vector.load %arg5[%c0_7, %c0_8] : memref<1x32xf32, #tpu.memory_space<vmem>>, vector<1x32xf32>
    %9 = vector.broadcast %8 : vector<1x32xf32> to vector<2x32xf32>
    %10 = arith.mulf %1, %9 : vector<2x32xf32>
    %cst_9 = arith.constant dense<0.000000e+00> : vector<2xf32>
    %11 = vector.multi_reduction <add>, %10, %cst_9 [1] : vector<2x32xf32> to vector<2xf32>
    %12 = vector.shape_cast %11 : vector<2xf32> to vector<2x1xf32>
    %13 = arith.addf %7, %12 : vector<2x1xf32>
    %c0_10 = arith.constant 0 : index
    %c0_11 = arith.constant 0 : index
    %14 = vector.load %arg6[%c0_10, %c0_11] : memref<1x192xf32, #tpu.memory_space<vmem>>, vector<1x192xf32>
    %15 = vector.broadcast %14 : vector<1x192xf32> to vector<2x192xf32>
    %16 = arith.mulf %2, %15 : vector<2x192xf32>
    %cst_12 = arith.constant dense<0.000000e+00> : vector<2xf32>
    %17 = vector.multi_reduction <add>, %16, %cst_12 [1] : vector<2x192xf32> to vector<2xf32>
    %18 = vector.shape_cast %17 : vector<2xf32> to vector<2x1xf32>
    %19 = arith.addf %13, %18 : vector<2x1xf32>
    %c0_13 = arith.constant 0 : index
    %c0_14 = arith.constant 0 : index
    %20 = vector.load %arg7[%c0_13, %c0_14] : memref<1x1xf32, #tpu.memory_space<vmem>>, vector<1x1xf32>
    %21 = vector.broadcast %20 : vector<1x1xf32> to vector<2x1xf32>
    %22 = arith.addf %19, %21 : vector<2x1xf32>
    %cst_15 = arith.constant 0.000000e+00 : f32
    %23 = vector.broadcast %cst_15 : f32 to vector<2x1xf32>
    %24 = arith.maximumf %22, %23 : vector<2x1xf32>
    %c0_16 = arith.constant 0 : index
    %c0_17 = arith.constant 0 : index
    %25 = vector.load %arg8[%c0_16, %c0_17] : memref<2x1xf32, #tpu.memory_space<vmem>>, vector<2x1xf32>
    tpu.vector_store %arg8[%c0_16, %c0_17], %24 {strides = array<i32>} : memref<2x1xf32, #tpu.memory_space<vmem>>, vector<2x1xf32>,
    return
  }
  func.func @transform_0(%arg0: i32) -> (i32, i32) {
    %c0_i32 = arith.constant 0 : i32
    %c0_i32_0 = arith.constant 0 : i32
    return %arg0, %c0_i32 : i32, i32
  }
  func.func @transform_1(%arg0: i32) -> (i32, i32) {
    %c0_i32 = arith.constant 0 : i32
    %c0_i32_0 = arith.constant 0 : i32
    return %arg0, %c0_i32 : i32, i32
  }
  func.func @transform_2(%arg0: i32) -> (i32, i32) {
    %c0_i32 = arith.constant 0 : i32
    %c0_i32_0 = arith.constant 0 : i32
    return %arg0, %c0_i32 : i32, i32
  }
  func.func @transform_3(%arg0: i32) -> (i32, i32) {
    %c0_i32 = arith.constant 0 : i32
    %c0_i32_0 = arith.constant 0 : i32
    %c0_i32_1 = arith.constant 0 : i32
    return %c0_i32, %c0_i32_0 : i32, i32
  }
  func.func @transform_4(%arg0: i32) -> (i32, i32) {
    %c0_i32 = arith.constant 0 : i32
    %c0_i32_0 = arith.constant 0 : i32
    %c0_i32_1 = arith.constant 0 : i32
    return %c0_i32, %c0_i32_0 : i32, i32
  }
  func.func @transform_5(%arg0: i32) -> (i32, i32) {
    %c0_i32 = arith.constant 0 : i32
    %c0_i32_0 = arith.constant 0 : i32
    %c0_i32_1 = arith.constant 0 : i32
    return %c0_i32, %c0_i32_0 : i32, i32
  }
  func.func @transform_6(%arg0: i32) -> (i32, i32) {
    %c0_i32 = arith.constant 0 : i32
    %c0_i32_0 = arith.constant 0 : i32
    %c0_i32_1 = arith.constant 0 : i32
    return %c0_i32, %c0_i32_0 : i32, i32
  }
  func.func @transform_7(%arg0: i32) -> (i32, i32) {
    %c0_i32 = arith.constant 0 : i32
    %c0_i32_0 = arith.constant 0 : i32
    return %arg0, %c0_i32 : i32, i32
  }
}

</mosaic_0001>

<bundles_post_ra>
// kernel: tpu_custom_call.1
= control target key start
LH: loop header
LB: loop body
LE: loop exit
PB: predicated region body
PF: predicated region fallthrough
CT: control target
= control target key end

     0   :  { %s289_s0 = inlined_call_operand.hbm [shape: f32[2,160], index: 0, kind: input, shape index: {}]   ;;  %s290_s1 = inlined_call_operand.vmem [shape: f32[2,32], index: 1, kind: input, shape index: {}]   ;;  %s291_s2 = inlined_call_operand.hbm [shape: f32[2,192], index: 2, kind: input, shape index: {}]   ;;  %s292_s3 = inlined_call_operand.vmem [shape: f32[1,160], index: 3, kind: input, shape index: {}]   ;;  %s293_s4 = inlined_call_operand.hbm [shape: f32[1,32], index: 4, kind: input, shape index: {}]   ;;  %s294_s5 = inlined_call_operand.vmem [shape: f32[1,192], index: 5, kind: input, shape index: {}]   ;;  %s295_s6 = inlined_call_operand.<no memory space> [shape: f32[1,1], index: 6, kind: input, shape index: {}]   ;;  %s296_s7 = inlined_call_operand.vmem [shape: f32[2,1], index: 7, kind: output, shape index: {}]  }
   0x1   :  { %v12_v0 = vstv %s295_s6 }
   0x2   :  { %13 = vst [vmem:[#allocation2] sm:$0x1] %v12_v0 }
   0x3   :  { %14 = vsyncpa [#allocation4], 0 }
   0x4   :  { %15 = vsyncpa [#allocation6], 0  ;;  %s34_s28 = sshll.u32 %s291_s2, 4  ;;  %s218_s29 = smov [#allocation5]   ;;  %s35_s28 = int_to_ptr.hbm [resolvable:$true] %s34_s28 }
   0x5   :  { %s36_s30 = sshll.u32 %s218_s29, 4  ;;  %s21_s10 = sshll.u32 %s289_s0, 4  ;;  %s37_s30 = int_to_ptr.vmem [resolvable:$true] %s36_s30  ;;  %s22_s10 = int_to_ptr.hbm [resolvable:$true] %s21_s10 }
   0x6   :  { %39 = dma.hbm_to_vmem [thread:$0]  %s35_s28, 64, %s37_s30, [#allocation6]  }
   0x7   :  { %s219_s11 = smov [#allocation3]   ;;  %s47_s14 = sshll.u32 %s293_s4, 4  ;;  %s48_s14 = int_to_ptr.hbm [resolvable:$true] %s47_s14 }
   0x8   :  { %s23_s12 = sshll.u32 %s219_s11, 4  ;;  %s220_s2 = smov [#allocation7]   ;;  %s24_s12 = int_to_ptr.vmem [resolvable:$true] %s23_s12 }
   0x9   :  { %26 = dma.hbm_to_vmem [thread:$0]  %s22_s10, 64, %s24_s12, [#allocation4]  }
   0xa   :  { %s49_s15 = sshll.u32 %s220_s2, 4  ;;  %s50_s15 = int_to_ptr.vmem [resolvable:$true] %s49_s15 }
   0xb   :  { %52 = dma.hbm_to_vmem [thread:$0]  %s48_s14, 16, %s50_s15, [#allocation6]  }
   0xc   :  { %214 = dma.done.wait [#allocation4], 64  }
   0xd   :  { %215 = vsyncadd [#allocation4], 4294967232 }
   0xe   :  { %216 = dma.done.wait [#allocation6], 80  }
   0xf   :  { %217 = vsyncadd [#allocation6], 4294967216  ;;  %v72_v1 = vld [vmem:[%s292_s3] sm:$0x3]  ;;  %vm77_vm0 = vcmask 1041408   ;;  %vm88_vm1 = vcmask 254976  }
  0x10   :  { %v74_v2 = vperm.slane %v72_v1, 0  ;;  %v75_v3 = vperm.slane %v72_v1, 1  ;;  %v102_v4 = vld [vmem:[%s294_s5] sm:$0x3]  ;;  %v69_v6 = vld [vmem:[#allocation3] sm:$0xf] }
  0x11   :  { %v105_v5 = vperm.slane %v102_v4, 1  ;;  %v104_v9 = vperm.slane %v102_v4, 0  ;;  %v71_v12 = vld [vmem:[#allocation5] sm:$0xf]  ;;  %v140_v19 = vld [vmem:[#allocation7] ss:$0 sm:$0xff] }
  0x12   :  { %v76_v7 = vrot.slane %v75_v3, 6  ;;  %v70_v21 = vld [vmem:[%s290_s1] sm:$0x3]  ;;  %vm117_vm2 = vcmask 517120   ;;  %v141_v33 = vld [vmem:[#allocation2] ss:$0 sm:$0xff] }
  0x13   :  { %v106_v10 = vrot.slane %v105_v5, 6  ;;  %v97_v22 = vmul.f32 %v140_v19, %v70_v21  ;;  %vm129_vm3 = vcmask 1024  }
  0x14   :  { %v78_v8 = vsel %vm77_vm0, %v74_v2, %v76_v7 }
  0x15   :  { %v80_v11 = vmul.f32 %v78_v8, %v69_v6  ;;  %v107_v13 = vsel %vm77_vm0, %v104_v9, %v106_v10  ;;  %v98_v25 = vsel %vm88_vm1, %v97_v22, 0.0 }
  0x16   :  { %v109_v14 = vmul.f32 %v107_v13, %v71_v12 }
  0x17   :  { %82 = vst [vmem:[#allocation1] ss:$4 sm:$0xff] %v80_v11 }
  0x1e   :  { %v83_v15 = vld.sshfl [vmem:[#allocation1] sm:$0xff pattern:$0x73625140]  ;;  %v84_v16 = vld.sshfl [vmem:[#allocation1 + $0x8] sm:$0xff pattern:$0x73625140] }
  0x1f   :  { %v87_v17 = vsel %vm77_vm0, %v83_v15, 0.0  ;;  %v89_v18 = vsel %vm88_vm1, %v84_v16, 0.0  ;;  %111 = vst [vmem:[#allocation1] ss:$4 sm:$0xff] %v109_v14 }
  0x20   :  { %v90_v20 = vadd.f32 %v89_v18, %v87_v17 }
  0x22   :  { %91 = vadd.xlane.f32.xlu0 %v90_v20 }
  0x26   :  { %v112_v23 = vld.sshfl [vmem:[#allocation1] sm:$0xff pattern:$0x73625140]  ;;  %v113_v24 = vld.sshfl [vmem:[#allocation1 + $0x8] sm:$0xff pattern:$0x73625140] }
  0x27   :  { %v116_v26 = vsel %vm77_vm0, %v112_v23, 0.0  ;;  %v118_v27 = vsel %vm117_vm2, %v113_v24, 0.0 }
  0x28   :  { %v119_v28 = vadd.f32 %v118_v27, %v116_v26 }
  0x2a   :  { %99 = vadd.xlane.f32.xlu0 %v98_v25  ;;  %120 = vadd.xlane.f32.xlu1 %v119_v28 }
  0x95   :  { %v92_v29 = vpop.xlane.xlu0 %91 }
  0x9d   :  { %v100_v30 = vpop.xlane.xlu0 %99  ;;  %v121_v31 = vpop.xlane.xlu1 %120 }
  0x9e   :  { %v101_v32 = vadd.f32 %v100_v30, %v92_v29 }
  0xa0   :  { %v122_v34 = vadd.f32 %v121_v31, %v101_v32 }
  0xa2   :  { %v127_v35 = vadd.f32 %v141_v33, %v122_v34 }
  0xa4   :  { %v128_v36 = vmax.f32 %v127_v35, 0.0 }
  0xa6   :  { %130 = vst.msk [vmem:[%s296_s7] sm:$0x3] %vm129_vm3, %v128_v36 }
  0xa7   :  { %135 = vsyncpa [#allocation4], 1 }
  0xa8   :  { %136 = vsyncpa [#allocation6], 1 }

</bundles_post_ra>
